<compile_context>
chip_gen: v5e
topology: v5e:2x2
jax: 0.10.0
libtpu: 0.0.40
codegen_flags: <defaults>
</compile_context>

<pallas_src>
import functools

import jax
import jax.numpy as jnp
from jax.experimental import pallas as pl
from jax.experimental.pallas import tpu as pltpu


# Largest batch tile: 512-1024 rows amortizes the ~0.35us/step grid overhead;
# VMEM cost even double-buffered is ~1-2 MiB, far under every generation's cap.
_MAX_TILE_B = 1024
# Make the number of grid steps a multiple of this so v7x's two TensorCores get
# balanced work on the "parallel" batch axis. Harmless on single-TC v5e/v6e.
_NUM_TC_BALANCE = 2


def _qfunction_kernel(x_ref, w1_ref, b1_ref, w2_ref, b2_ref, w3_ref, b3_ref, o_ref):
    """One batch tile of the full MLP forward pass.

    x_ref : [TB, state_dim]            (f32 or bf16 operands)
    w1_ref: [state_dim, H]             b1_ref: [1, H]        (biases f32)
    w2_ref: [H, H]                     b2_ref: [1, H]
    w3_ref: [H, action_n]              b3_ref: [1, action_n]
    o_ref : [TB, action_n]             (f32)
    """
    op_dtype = w1_ref.dtype  # f32 (parity mode) or bf16 (fast operand path)

    # Layer 1: Linear + ReLU (MXU matmul, f32 accumulation).
    h1 = jnp.dot(x_ref[...], w1_ref[...], preferred_element_type=jnp.float32)
    h1 = jnp.maximum(h1 + b1_ref[...], 0.0)

    # Layer 2: Linear + ReLU.
    h2 = jnp.dot(h1.astype(op_dtype), w2_ref[...], preferred_element_type=jnp.float32)
    h2 = jnp.maximum(h2 + b2_ref[...], 0.0)

    # Layer 3: Linear (no activation) -> Q-values, written at true lane width.
    out = jnp.dot(h2.astype(op_dtype), w3_ref[...], preferred_element_type=jnp.float32)
    o_ref[...] = (out + b3_ref[...]).astype(o_ref.dtype)


def _round_up(x, m):
    return (x + m - 1) // m * m


@functools.partial(jax.jit, static_argnames=("use_bf16",))
def qfunction_forward(states, params, *, use_bf16=False):
    """Pallas forward pass of QFunction. states: [B, state_dim] float32."""
    w1, b1, w2, b2, w3, b3 = params
    B, state_dim = states.shape
    H = w1.shape[1]
    action_n = w3.shape[1]

    # Operand dtype: bf16 halves operand DMA and uses the single-pass MXU path;
    # accumulation / bias add / ReLU stay f32 either way.
    op_dtype = jnp.bfloat16 if use_bf16 else jnp.float32
    x = states.astype(op_dtype)
    w1o, w2o, w3o = (w.astype(op_dtype) for w in (w1, w2, w3))

    # Biases as 2-D rows (f32 = accumulator dtype) so they broadcast cleanly.
    b1r = b1.reshape(1, H).astype(jnp.float32)
    b2r = b2.reshape(1, H).astype(jnp.float32)
    b3r = b3.reshape(1, action_n).astype(jnp.float32)

    weight_args = (w1o, b1r, w2o, b2r, w3o, b3r)
    # Constant-index blocks: fetched once, kept resident across grid steps.
    # TODO(synk): pipeline_mode=pl.Buffered(1) would drop the unused second
    # VMEM buffer for these (~160 KiB); skipped as the saving is negligible.
    weight_specs = [
        pl.BlockSpec((state_dim, H), lambda i: (0, 0)),   # W1
        pl.BlockSpec((1, H), lambda i: (0, 0)),           # b1
        pl.BlockSpec((H, H), lambda i: (0, 0)),           # W2
        pl.BlockSpec((1, H), lambda i: (0, 0)),           # b2
        pl.BlockSpec((H, action_n), lambda i: (0, 0)),    # W3
        pl.BlockSpec((1, action_n), lambda i: (0, 0)),    # b3
    ]

    if B <= _MAX_TILE_B:
        # Small-batch fast path: one grid step, full-array blocks (always legal
        # block shapes), no batch padding and no output trimming.
        tile_b = B
        grid = (1,)
        semantics = ("arbitrary",)
    else:
        # Pick tile_b so the number of grid steps is a multiple of
        # _NUM_TC_BALANCE (balanced megacore split on v7x) and each tile is at
        # most _MAX_TILE_B rows. The ragged last block is masked by Pallas, so
        # no jnp.pad / trailing slice kernels are needed.
        steps = _NUM_TC_BALANCE * pl.cdiv(B, _NUM_TC_BALANCE * _MAX_TILE_B)
        tile_b = _round_up(pl.cdiv(B, steps), 16)  # 16: sublane-safe for bf16 too
        grid = (pl.cdiv(B, tile_b),)
        semantics = ("parallel",)

    out = pl.pallas_call(
        _qfunction_kernel,
        out_shape=jax.ShapeDtypeStruct((B, action_n), jnp.float32),
        grid_spec=pltpu.PrefetchScalarGridSpec(
            num_scalar_prefetch=0,
            grid=grid,
            in_specs=[pl.BlockSpec((tile_b, state_dim), lambda i: (i, 0))]
            + weight_specs,
            out_specs=pl.BlockSpec((tile_b, action_n), lambda i: (i, 0)),
        ),
        compiler_params=pltpu.CompilerParams(dimension_semantics=semantics),
    )(x, *weight_args)
    return out


def init_qfunction_params(key, state_dim, action_n, inner_layer=128):
    """Deterministic init mirroring nn.Linear's U(-1/sqrt(fan_in), 1/sqrt(fan_in)).

    Weights are stored transposed: [in_features, out_features].
    """
    ks = jax.random.split(key, 6)

    def linear(kw, kb, fan_in, fan_out):
        bound = 1.0 / jnp.sqrt(jnp.float32(fan_in))
        w = jax.random.uniform(kw, (fan_in, fan_out), jnp.float32, -bound, bound)
        b = jax.random.uniform(kb, (fan_out,), jnp.float32, -bound, bound)
        return w, b

    w1, b1 = linear(ks[0], ks[1], state_dim, inner_layer)
    w2, b2 = linear(ks[2], ks[3], inner_layer, inner_layer)
    w3, b3 = linear(ks[4], ks[5], inner_layer, action_n)
    return (w1, b1, w2, b2, w3, b3)


def qfunction_reference(states, params):
    """Pure-JAX reference (same math as the PyTorch module)."""
    w1, b1, w2, b2, w3, b3 = params
    h = jnp.maximum(states @ w1 + b1, 0.0)
    h = jnp.maximum(h @ w2 + b2, 0.0)
    return h @ w3 + b3


if __name__ == "__main__":
    key = jax.random.PRNGKey(0)
    k_param, k_small, k_big = jax.random.split(key, 3)

    state_dim = 8
    action_n = 4
    inner_layer = 128

    params = init_qfunction_params(k_param, state_dim, action_n, inner_layer)

    # Small batch (single-block fast path).
    batch = 2
    states = jax.random.normal(k_small, (batch, state_dim), dtype=jnp.float32)
    out = jax.block_until_ready(qfunction_forward(states, params))
    ref = qfunction_reference(states, params)
    assert out.shape == (batch, action_n), out.shape
    assert jnp.allclose(out, ref, atol=1e-5, rtol=1e-5), (out, ref)

    # Larger batch: tiled "parallel" grid (balanced steps) with a ragged tail,
    # no input padding and no post-call slicing.
    big_batch = 2600
    states_big = jax.random.normal(k_big, (big_batch, state_dim), dtype=jnp.float32)
    out_big = jax.block_until_ready(qfunction_forward(states_big, params))
    ref_big = qfunction_reference(states_big, params)
    assert out_big.shape == (big_batch, action_n), out_big.shape
    assert jnp.allclose(out_big, ref_big, atol=1e-4, rtol=1e-5)

    # Optional bf16-operand path (f32 accumulation) -- relaxed tolerance.
    out_bf16 = jax.block_until_ready(
        qfunction_forward(states_big, params, use_bf16=True)
    )
    assert out_bf16.shape == (big_batch, action_n), out_bf16.shape
    assert jnp.allclose(out_bf16, ref_big, atol=2e-2, rtol=2e-2)

    print("KERNEL_OK")
</pallas_src>

<mosaic_0001>
module attributes {stable_mosaic.version = 11 : i64} {
  func.func @_qfunction_kernel(%arg0: i32, %arg1: memref<2x8xf32, #tpu.memory_space<vmem>>, %arg2: memref<8x128xf32, #tpu.memory_space<vmem>>, %arg3: memref<1x128xf32, #tpu.memory_space<vmem>>, %arg4: memref<128x128xf32, #tpu.memory_space<vmem>>, %arg5: memref<1x128xf32, #tpu.memory_space<vmem>>, %arg6: memref<128x4xf32, #tpu.memory_space<vmem>>, %arg7: memref<1x4xf32, #tpu.memory_space<vmem>>, %arg8: memref<2x4xf32, #tpu.memory_space<vmem>>) attributes {dimension_semantics = [#tpu.dimension_semantics<arbitrary>], iteration_bounds = array<i64: 1>, scalar_prefetch = 0 : i64, scratch_operands = 0 : i64, tpu.core_type = #tpu.core_type<tc>, window_params = [{transform_indices = @transform_0, window_bounds = array<i64: 2, 8>}, {pipeline_mode = #tpu.pipeline_mode<synchronous>, transform_indices = @transform_1, window_bounds = array<i64: 8, 128>}, {pipeline_mode = #tpu.pipeline_mode<synchronous>, transform_indices = @transform_2, window_bounds = array<i64: 1, 128>}, {pipeline_mode = #tpu.pipeline_mode<synchronous>, transform_indices = @transform_3, window_bounds = array<i64: 128, 128>}, {pipeline_mode = #tpu.pipeline_mode<synchronous>, transform_indices = @transform_4, window_bounds = array<i64: 1, 128>}, {pipeline_mode = #tpu.pipeline_mode<synchronous>, transform_indices = @transform_5, window_bounds = array<i64: 128, 4>}, {pipeline_mode = #tpu.pipeline_mode<synchronous>, transform_indices = @transform_6, window_bounds = array<i64: 1, 4>}, {transform_indices = @transform_7, window_bounds = array<i64: 2, 4>}]} {
    %c0 = arith.constant 0 : index
    %c0_0 = arith.constant 0 : index
    %0 = vector.load %arg1[%c0, %c0_0] : memref<2x8xf32, #tpu.memory_space<vmem>>, vector<2x8xf32>
    %c0_1 = arith.constant 0 : index
    %c0_2 = arith.constant 0 : index
    %1 = vector.load %arg2[%c0_1, %c0_2] : memref<8x128xf32, #tpu.memory_space<vmem>>, vector<8x128xf32>
    %cst = arith.constant dense<0.000000e+00> : vector<2x128xf32>
    %2 = tpu.matmul %0, %1, %cst {dimension_numbers = #tpu.dot_dimension_numbers<[1], [0], [0], [1], [0, 0, 1, 1], [], []>} : vector<2x8xf32>, vector<8x128xf32>, vector<2x128xf32> -> vector<2x128xf32>
    %c0_3 = arith.constant 0 : index
    %c0_4 = arith.constant 0 : index
    %3 = vector.load %arg3[%c0_3, %c0_4] : memref<1x128xf32, #tpu.memory_space<vmem>>, vector<1x128xf32>
    %4 = vector.broadcast %3 : vector<1x128xf32> to vector<2x128xf32>
    %5 = arith.addf %2, %4 : vector<2x128xf32>
    %cst_5 = arith.constant 0.000000e+00 : f32
    %6 = vector.broadcast %cst_5 : f32 to vector<2x128xf32>
    %7 = arith.maximumf %5, %6 : vector<2x128xf32>
    %c0_6 = arith.constant 0 : index
    %c0_7 = arith.constant 0 : index
    %8 = vector.load %arg4[%c0_6, %c0_7] : memref<128x128xf32, #tpu.memory_space<vmem>>, vector<128x128xf32>
    %cst_8 = arith.constant dense<0.000000e+00> : vector<2x128xf32>
    %9 = tpu.matmul %7, %8, %cst_8 {dimension_numbers = #tpu.dot_dimension_numbers<[1], [0], [0], [1], [0, 0, 1, 1], [], []>} : vector<2x128xf32>, vector<128x128xf32>, vector<2x128xf32> -> vector<2x128xf32>
    %c0_9 = arith.constant 0 : index
    %c0_10 = arith.constant 0 : index
    %10 = vector.load %arg5[%c0_9, %c0_10] : memref<1x128xf32, #tpu.memory_space<vmem>>, vector<1x128xf32>
    %11 = vector.broadcast %10 : vector<1x128xf32> to vector<2x128xf32>
    %12 = arith.addf %9, %11 : vector<2x128xf32>
    %cst_11 = arith.constant 0.000000e+00 : f32
    %13 = vector.broadcast %cst_11 : f32 to vector<2x128xf32>
    %14 = arith.maximumf %12, %13 : vector<2x128xf32>
    %c0_12 = arith.constant 0 : index
    %c0_13 = arith.constant 0 : index
    %15 = vector.load %arg6[%c0_12, %c0_13] : memref<128x4xf32, #tpu.memory_space<vmem>>, vector<128x4xf32>
    %cst_14 = arith.constant dense<0.000000e+00> : vector<2x4xf32>
    %16 = tpu.matmul %14, %15, %cst_14 {dimension_numbers = #tpu.dot_dimension_numbers<[1], [0], [0], [1], [0, 0, 1, 1], [], []>} : vector<2x128xf32>, vector<128x4xf32>, vector<2x4xf32> -> vector<2x4xf32>
    %c0_15 = arith.constant 0 : index
    %c0_16 = arith.constant 0 : index
    %17 = vector.load %arg7[%c0_15, %c0_16] : memref<1x4xf32, #tpu.memory_space<vmem>>, vector<1x4xf32>
    %18 = vector.broadcast %17 : vector<1x4xf32> to vector<2x4xf32>
    %19 = arith.addf %16, %18 : vector<2x4xf32>
    %c0_17 = arith.constant 0 : index
    %c0_18 = arith.constant 0 : index
    %20 = vector.load %arg8[%c0_17, %c0_18] : memref<2x4xf32, #tpu.memory_space<vmem>>, vector<2x4xf32>
    tpu.vector_store %arg8[%c0_17, %c0_18], %19 {strides = array<i32>} : memref<2x4xf32, #tpu.memory_space<vmem>>, vector<2x4xf32>,
    return
  }
  func.func @transform_0(%arg0: i32) -> (i32, i32) {
    %c0_i32 = arith.constant 0 : i32
    %c0_i32_0 = arith.constant 0 : i32
    return %arg0, %c0_i32 : i32, i32
  }
  func.func @transform_1(%arg0: i32) -> (i32, i32) {
    %c0_i32 = arith.constant 0 : i32
    %c0_i32_0 = arith.constant 0 : i32
    %c0_i32_1 = arith.constant 0 : i32
    return %c0_i32, %c0_i32_0 : i32, i32
  }
  func.func @transform_2(%arg0: i32) -> (i32, i32) {
    %c0_i32 = arith.constant 0 : i32
    %c0_i32_0 = arith.constant 0 : i32
    %c0_i32_1 = arith.constant 0 : i32
    return %c0_i32, %c0_i32_0 : i32, i32
  }
  func.func @transform_3(%arg0: i32) -> (i32, i32) {
    %c0_i32 = arith.constant 0 : i32
    %c0_i32_0 = arith.constant 0 : i32
    %c0_i32_1 = arith.constant 0 : i32
    return %c0_i32, %c0_i32_0 : i32, i32
  }
  func.func @transform_4(%arg0: i32) -> (i32, i32) {
    %c0_i32 = arith.constant 0 : i32
    %c0_i32_0 = arith.constant 0 : i32
    %c0_i32_1 = arith.constant 0 : i32
    return %c0_i32, %c0_i32_0 : i32, i32
  }
  func.func @transform_5(%arg0: i32) -> (i32, i32) {
    %c0_i32 = arith.constant 0 : i32
    %c0_i32_0 = arith.constant 0 : i32
    %c0_i32_1 = arith.constant 0 : i32
    return %c0_i32, %c0_i32_0 : i32, i32
  }
  func.func @transform_6(%arg0: i32) -> (i32, i32) {
    %c0_i32 = arith.constant 0 : i32
    %c0_i32_0 = arith.constant 0 : i32
    %c0_i32_1 = arith.constant 0 : i32
    return %c0_i32, %c0_i32_0 : i32, i32
  }
  func.func @transform_7(%arg0: i32) -> (i32, i32) {
    %c0_i32 = arith.constant 0 : i32
    %c0_i32_0 = arith.constant 0 : i32
    return %arg0, %c0_i32 : i32, i32
  }
}

</mosaic_0001>

<bundles_post_ra>
// kernel: qfunction_forward.1
= control target key start
LH: loop header
LB: loop body
LE: loop exit
PB: predicated region body
PF: predicated region fallthrough
CT: control target
= control target key end

     0   :  { %12 = vsyncpa [#allocation3], 0  ;;  %s386_s0 = inlined_call_operand.vmem [shape: f32[2,8], index: 0, kind: input, shape index: {}]   ;;  %s387_s1 = inlined_call_operand.hbm [shape: f32[8,128], index: 1, kind: input, shape index: {}]   ;;  %s388_s2 = inlined_call_operand.vmem [shape: f32[1,128], index: 2, kind: input, shape index: {}]   ;;  %s389_s3 = inlined_call_operand.vmem [shape: f32[128,128], index: 3, kind: input, shape index: {}]   ;;  %s390_s4 = inlined_call_operand.vmem [shape: f32[1,128], index: 4, kind: input, shape index: {}]   ;;  %s391_s5 = inlined_call_operand.vmem [shape: f32[128,4], index: 5, kind: input, shape index: {}]   ;;  %s392_s6 = inlined_call_operand.vmem [shape: f32[1,4], index: 6, kind: input, shape index: {}]   ;;  %s393_s7 = inlined_call_operand.hbm [shape: f32[2,4], index: 7, kind: output, shape index: {}]  }
   0x1   :  { %13 = vsyncpa [#allocation4], 0  ;;  %s21_s26 = sshll.u32 %s387_s1, 4  ;;  %s230_s27 = smov [#allocation2]   ;;  %s22_s26 = int_to_ptr.hbm [resolvable:$true] %s21_s26 }
   0x2   :  { %s23_s28 = sshll.u32 %s230_s27, 4  ;;  %s24_s28 = int_to_ptr.vmem [resolvable:$true] %s23_s28 }
   0x3   :  { %26 = dma.hbm_to_vmem [thread:$0]  %s22_s26, 128, %s24_s28, [#allocation3]  }
   0x4   :  { %226 = dma.done.wait [#allocation3], 128  }
   0x5   :  { %227 = vsyncadd [#allocation3], 4294967168  ;;  %vm47_vm0 = vcmask 64512   ;;  %v42_v0 = vld [vmem:[#allocation2] sm:$0xff]  ;;  %v87_v2 = vld [vmem:[%s389_s3 + $0x78] sm:$0xff]  ;;  %s231_s23 = smov [#allocation5]  }
   0x6   :  { %v41_v1 = vld [vmem:[%s386_s0] sm:$0x3]  ;;  %66 = vmatpush.msra.mxu0 %v42_v0  ;;  %92 = vmatpush.msra.mxu1 %v87_v2  ;;  %v86_v3 = vld [vmem:[%s389_s3 + $0x70] sm:$0xff]  ;;  %v85_v4 = vld [vmem:[%s389_s3 + $0x68] sm:$0xff]  ;;  %s160_s24 = sshll.u32 %s231_s23, 4  ;;  %s162_s27 = sshll.u32 %s393_s7, 4  ;;  %s161_s24 = int_to_ptr.vmem [resolvable:$true] %s160_s24  ;;  %s163_s27 = int_to_ptr.hbm [resolvable:$true] %s162_s27 }
   0x7   :  { %172 = vmatmul.msk.f32.vlgmr.msra.gmra.mxu0 %vm47_vm0, %v41_v1  ;;  %v84_v5 = vld [vmem:[%s389_s3 + $0x60] sm:$0xff]  ;;  %v83_v6 = vld [vmem:[%s389_s3 + $0x58] sm:$0xff]  ;;  %v82_v7 = vld [vmem:[%s389_s3 + $0x50] sm:$0xff]  ;;  %vm153_vm1 = vcmask 25600  }
   0x8   :  { %93 = vmatpush.msra.mxu1 %v86_v3  ;;  %v81_v8 = vld [vmem:[%s389_s3 + $0x48] sm:$0xff]  ;;  %v80_v9 = vld [vmem:[%s389_s3 + $0x40] sm:$0xff]  ;;  %v79_v10 = vld [vmem:[%s389_s3 + $0x38] sm:$0xff] }
   0x9   :  { %v78_v11 = vld [vmem:[%s389_s3 + $0x30] sm:$0xff]  ;;  %v77_v12 = vld [vmem:[%s389_s3 + $0x28] sm:$0xff]  ;;  %v76_v13 = vld [vmem:[%s389_s3 + $0x20] sm:$0xff] }
   0xa   :  { %94 = vmatpush.msra.mxu1 %v85_v4  ;;  %v75_v14 = vld [vmem:[%s389_s3 + $0x18] sm:$0xff]  ;;  %v74_v15 = vld [vmem:[%s389_s3 + $0x10] sm:$0xff]  ;;  %v73_v16 = vld [vmem:[%s389_s3 + $0x8] sm:$0xff] }
   0xb   :  { %v72_v17 = vld [vmem:[%s389_s3] sm:$0xff]  ;;  %v128_v18 = vld [vmem:[%s391_s5 + $0x78] sm:$0xff]  ;;  %v127_v19 = vld [vmem:[%s391_s5 + $0x70] sm:$0xff] }
   0xc   :  { %95 = vmatpush.msra.mxu1 %v84_v5  ;;  %133 = vmatpush.msra.mxu2 %v128_v18  ;;  %v126_v20 = vld [vmem:[%s391_s5 + $0x68] sm:$0xff]  ;;  %v125_v21 = vld [vmem:[%s391_s5 + $0x60] sm:$0xff]  ;;  %v124_v22 = vld [vmem:[%s391_s5 + $0x58] sm:$0xff] }
   0xd   :  { %v123_v23 = vld [vmem:[%s391_s5 + $0x50] sm:$0xff]  ;;  %v122_v24 = vld [vmem:[%s391_s5 + $0x48] sm:$0xff]  ;;  %v121_v25 = vld [vmem:[%s391_s5 + $0x40] sm:$0xff] }
   0xe   :  { %96 = vmatpush.msra.mxu1 %v83_v6  ;;  %134 = vmatpush.msra.mxu2 %v127_v19  ;;  %v120_v26 = vld [vmem:[%s391_s5 + $0x38] sm:$0xff]  ;;  %v119_v27 = vld [vmem:[%s391_s5 + $0x30] sm:$0xff]  ;;  %v118_v28 = vld [vmem:[%s391_s5 + $0x28] sm:$0xff] }
   0xf   :  { %v117_v29 = vld [vmem:[%s391_s5 + $0x20] sm:$0xff]  ;;  %v116_v30 = vld [vmem:[%s391_s5 + $0x18] sm:$0xff]  ;;  %v115_v35 = vld [vmem:[%s391_s5 + $0x10] sm:$0xff] }
  0x10   :  { %97 = vmatpush.msra.mxu1 %v82_v7  ;;  %135 = vmatpush.msra.mxu2 %v126_v20  ;;  %v175_v31 = vld [vmem:[%s388_s2] ss:$0 sm:$0xff]  ;;  %v114_v36 = vld [vmem:[%s391_s5 + $0x8] sm:$0xff] }
  0x11   :  { %v113_v37 = vld [vmem:[%s391_s5] sm:$0xff] }
  0x12   :  { %98 = vmatpush.msra.mxu1 %v81_v8  ;;  %136 = vmatpush.msra.mxu2 %v125_v21  ;;  %v176_v38 = vld [vmem:[%s390_s4] ss:$0 sm:$0xff] }
  0x13   :  { %v177_v42 = vld [vmem:[%s392_s6] ss:$0 sm:$0xff] }
  0x14   :  { %99 = vmatpush.msra.mxu1 %v80_v9  ;;  %137 = vmatpush.msra.mxu2 %v124_v22 }
  0x16   :  { %100 = vmatpush.msra.mxu1 %v79_v10  ;;  %138 = vmatpush.msra.mxu2 %v123_v23 }
  0x18   :  { %101 = vmatpush.msra.mxu1 %v78_v11  ;;  %139 = vmatpush.msra.mxu2 %v122_v24 }
  0x1a   :  { %102 = vmatpush.msra.mxu1 %v77_v12  ;;  %140 = vmatpush.msra.mxu2 %v121_v25 }
  0x1c   :  { %103 = vmatpush.msra.mxu1 %v76_v13  ;;  %141 = vmatpush.msra.mxu2 %v120_v26 }
  0x1e   :  { %104 = vmatpush.msra.mxu1 %v75_v14  ;;  %142 = vmatpush.msra.mxu2 %v119_v27 }
  0x20   :  { %105 = vmatpush.msra.mxu1 %v74_v15  ;;  %143 = vmatpush.msra.mxu2 %v118_v28 }
  0x22   :  { %106 = vmatpush.msra.mxu1 %v73_v16  ;;  %144 = vmatpush.msra.mxu2 %v117_v29 }
  0x24   :  { %107 = vmatpush.msra.mxu1 %v72_v17  ;;  %145 = vmatpush.msra.mxu2 %v116_v30 }
  0x26   :  { %146 = vmatpush.msra.mxu2 %v115_v35 }
  0x28   :  { %147 = vmatpush.msra.mxu2 %v114_v36 }
  0x2a   :  { %148 = vmatpush.msra.mxu2 %v113_v37 }
  0x84   :  { %v68_v32 = vpop.f32.mrf.mxu0 }
  0x85   :  { %v69_v33 = vadd.f32 %v175_v31, %v68_v32 }
  0x87   :  { %v71_v34 = vmax.f32 %v69_v33, 0.0 }
  0x89   :  { %108 = vmatmul.f32.vlgmr.msra.gmra.mxu1 %v71_v34 }
 0x106   :  { %v109_v39 = vpop.f32.mrf.mxu1 }
 0x107   :  { %v110_v40 = vadd.f32 %v176_v38, %v109_v39 }
 0x109   :  { %v112_v41 = vmax.f32 %v110_v40, 0.0 }
 0x10b   :  { %149 = vmatmul.f32.vlgmr.msra.gmra.mxu2 %v112_v41 }
 0x18e   :  { %v150_v43 = vpop.f32.mrf.mxu2 }
 0x18f   :  { %v151_v44 = vadd.f32 %v177_v42, %v150_v43 }
 0x191   :  { %154 = vst.msk [vmem:[#allocation5] sm:$0x3] %vm153_vm1, %v151_v44 }
 0x192   :  { %165 = dma.vmem_to_hbm [thread:$0]  %s161_s24, 32, %s163_s27, [#allocation4]  }
 0x193   :  { %228 = dma.done.wait [#allocation4], 32  }
 0x194   :  { %229 = vsyncadd [#allocation4], 4294967264 }
 0x195   :  { %170 = vsyncpa [#allocation3], 1 }
 0x196   :  { %171 = vsyncpa [#allocation4], 1 }

</bundles_post_ra>
